<compile_context>
chip_gen: v5e
topology: v5e:2x2
jax: 0.10.0
libtpu: 0.0.40
codegen_flags: <defaults>
</compile_context>

<pallas_src>
import functools

import jax
import jax.numpy as jnp
from jax import lax
from jax.experimental import pallas as pl
from jax.experimental.pallas import tpu as pltpu


def _round_up(x, m):
    return ((x + m - 1) // m) * m


def patch_embed_kernel(p_ref, w_ref, b_ref, o_ref):
    # p_ref: (tm, K_pad)   w_ref: (K_pad, E_pad)   b_ref: (1, E_pad) f32
    # o_ref: (tm, E_pad)
    acc = jnp.dot(p_ref[...], w_ref[...], preferred_element_type=jnp.float32)
    o_ref[...] = (acc + b_ref[...]).astype(o_ref.dtype)


@functools.partial(jax.jit,
                   static_argnames=("patch_size", "compute_dtype", "out_dtype"))
def patch_embedding(x, weight, bias, patch_size, compute_dtype=None,
                    out_dtype=None):
    """x: (B, C, H, W) NCHW; weight: (E, C, P, P); bias: (E,) -> (B, n_patches, E)."""
    B, C, H, W = x.shape
    P = patch_size
    E = weight.shape[0]
    nh, nw = H // P, W // P
    n_patches = nh * nw
    K = C * P * P
    M = B * n_patches

    cdt = jnp.dtype(compute_dtype) if compute_dtype is not None else jnp.dtype(x.dtype)
    odt = jnp.dtype(out_dtype) if out_dtype is not None else jnp.dtype(x.dtype)
    cbytes = cdt.itemsize
    obytes = odt.itemsize

    # Padded problem dims: lane-dense output (E_pad % 128 == 0) and a full MXU
    # contraction dim (K_pad % 128 == 0).  Zero padding -> exact result.
    E_pad = _round_up(E, 128)
    K_pad = _round_up(K, 128)

    # --- M tile selection -----------------------------------------------------
    sub = 16 if cdt == jnp.bfloat16 else 8
    vmem_budget = 24 * 1024 * 1024  # leave headroom under the 32 MiB scoped limit

    def vmem_est(tm_):
        return (2 * tm_ * K_pad * cbytes        # patches, double-buffered
                + 2 * K_pad * E_pad * cbytes    # weight (counted 2x, conservative)
                + 2 * E_pad * 4                 # bias (f32)
                + 2 * tm_ * E_pad * obytes)     # output, double-buffered

    tm_cap = 1024
    while tm_cap > sub and vmem_est(tm_cap) > vmem_budget:
        tm_cap //= 2
    # At least 2 M tiles (megacore sharding on v7x) when M allows it.
    n_tiles = pl.cdiv(M, tm_cap)
    if n_tiles == 1 and M >= 2 * sub:
        n_tiles = 2
    tm = _round_up(pl.cdiv(M, n_tiles), sub)
    grid = (pl.cdiv(M, tm),)  # Pallas masks the partial last block.

    # --- Patchify: (B, C, H, W) -> (M, K_pad), k in (c, kh, kw) order ---------
    # Single XLA pass (transpose + pad + cast); allow_input_fusion below lets it
    # fuse into the pallas_call input DMA under jit.
    patches = x.reshape(B, C, nh, P, nw, P).transpose(0, 2, 4, 1, 3, 5)
    patches = patches.reshape(M, K)
    if K_pad != K:
        patches = jnp.pad(patches, ((0, 0), (0, K_pad - K)))
    patches = patches.astype(cdt)

    w = weight.reshape(E, K).T.astype(cdt)           # (K, E)
    b = bias.astype(jnp.float32).reshape(1, E)       # f32 bias epilogue
    if K_pad != K:
        w = jnp.pad(w, ((0, K_pad - K), (0, 0)))
    if E_pad != E:
        w = jnp.pad(w, ((0, 0), (0, E_pad - E)))
        b = jnp.pad(b, ((0, 0), (0, E_pad - E)))

    cost = pl.CostEstimate(
        flops=2 * M * K_pad * E_pad,
        transcendentals=0,
        bytes_accessed=(M * K_pad * cbytes + K_pad * E_pad * cbytes
                        + E_pad * 4 + M * E_pad * obytes),
    )

    out = pl.pallas_call(
        patch_embed_kernel,
        out_shape=jax.ShapeDtypeStruct((M, E_pad), odt),
        grid=grid,
        in_specs=[
            pl.BlockSpec((tm, K_pad), lambda i: (i, 0)),      # patch rows (pipelined over M)
            pl.BlockSpec((K_pad, E_pad), lambda i: (0, 0)),   # full weight: VMEM-resident
            pl.BlockSpec((1, E_pad), lambda i: (0, 0)),       # full bias: VMEM-resident
        ],
        out_specs=pl.BlockSpec((tm, E_pad), lambda i: (i, 0)),
        compiler_params=pltpu.CompilerParams(
            dimension_semantics=("parallel",),
            allow_input_fusion=[True, False, False],
            vmem_limit_bytes=32 * 1024 * 1024,
        ),
        cost_estimate=cost,
    )(patches, w, b)

    if E_pad != E:
        out = out[:, :E]
    return out.reshape(B, n_patches, E)


def reference_patch_embedding(x, weight, bias, patch_size):
    # Pure-JAX reference: strided conv (NCHW / OIHW), then flatten(2).transpose(1, 2).
    y = lax.conv_general_dilated(
        x, weight,
        window_strides=(patch_size, patch_size),
        padding="VALID",
        dimension_numbers=("NCHW", "OIHW", "NCHW"),
    ) + bias.reshape(1, -1, 1, 1)
    B, E, nh, nw = y.shape
    return y.reshape(B, E, nh * nw).transpose(0, 2, 1)


if __name__ == "__main__":
    img_size = 16
    patch_size = 4
    in_channels = 4
    embed_dim = 32
    batch = 2

    key = jax.random.PRNGKey(0)
    kx, kw, kb = jax.random.split(key, 3)

    x = jax.random.normal(kx, (batch, in_channels, img_size, img_size), dtype=jnp.float32)
    # Deterministic synthetic params (Conv2d weight (E, C, P, P), bias (E,))
    fan_in = in_channels * patch_size * patch_size
    bound = 1.0 / (fan_in ** 0.5)
    weight = jax.random.uniform(kw, (embed_dim, in_channels, patch_size, patch_size),
                                minval=-bound, maxval=bound, dtype=jnp.float32)
    bias = jax.random.uniform(kb, (embed_dim,), minval=-bound, maxval=bound,
                              dtype=jnp.float32)

    ref = reference_patch_embedding(x, weight, bias, patch_size)
    n_patches = (img_size // patch_size) ** 2

    # f32 path (matches PyTorch numerics).
    out = jax.block_until_ready(patch_embedding(x, weight, bias, patch_size=patch_size))
    assert out.shape == (batch, n_patches, embed_dim)
    assert jnp.allclose(out, ref, atol=1e-5, rtol=1e-5)

    # bf16 compute path (f32 MXU accumulation) — halves the patch read on all gens.
    out_bf16 = jax.block_until_ready(
        patch_embedding(x, weight, bias, patch_size=patch_size,
                        compute_dtype=jnp.bfloat16))
    assert out_bf16.shape == out.shape
    assert jnp.allclose(out_bf16, ref, atol=5e-2, rtol=5e-2)

    # bf16 compute + bf16 storage — also halves the output store.
    out_bf16o = jax.block_until_ready(
        patch_embedding(x, weight, bias, patch_size=patch_size,
                        compute_dtype=jnp.bfloat16, out_dtype=jnp.bfloat16))
    assert out_bf16o.dtype == jnp.bfloat16
    assert jnp.allclose(out_bf16o.astype(jnp.float32), ref, atol=5e-2, rtol=5e-2)

    print("KERNEL_OK")
</pallas_src>

<mosaic_0001>
module attributes {stable_mosaic.version = 11 : i64} {
  func.func @patch_embed_kernel(%arg0: i32, %arg1: memref<16x128xf32, #tpu.memory_space<vmem>>, %arg2: memref<128x128xf32, #tpu.memory_space<vmem>>, %arg3: memref<1x128xf32, #tpu.memory_space<vmem>>, %arg4: memref<16x128xf32, #tpu.memory_space<vmem>>) attributes {dimension_semantics = [#tpu.dimension_semantics<parallel>], iteration_bounds = array<i64: 2>, scalar_prefetch = 0 : i64, scratch_operands = 0 : i64, tpu.core_type = #tpu.core_type<tc>, window_params = [{transform_indices = @transform_0, window_bounds = array<i64: 16, 128>}, {pipeline_mode = #tpu.pipeline_mode<synchronous>, transform_indices = @transform_1, window_bounds = array<i64: 128, 128>}, {pipeline_mode = #tpu.pipeline_mode<synchronous>, transform_indices = @transform_2, window_bounds = array<i64: 1, 128>}, {transform_indices = @transform_3, window_bounds = array<i64: 16, 128>}]} {
    %c0 = arith.constant 0 : index
    %c0_0 = arith.constant 0 : index
    %0 = vector.load %arg1[%c0, %c0_0] : memref<16x128xf32, #tpu.memory_space<vmem>>, vector<16x128xf32>
    %c0_1 = arith.constant 0 : index
    %c0_2 = arith.constant 0 : index
    %1 = vector.load %arg2[%c0_1, %c0_2] : memref<128x128xf32, #tpu.memory_space<vmem>>, vector<128x128xf32>
    %cst = arith.constant dense<0.000000e+00> : vector<16x128xf32>
    %2 = tpu.matmul %0, %1, %cst {dimension_numbers = #tpu.dot_dimension_numbers<[1], [0], [0], [1], [0, 0, 1, 1], [], []>} : vector<16x128xf32>, vector<128x128xf32>, vector<16x128xf32> -> vector<16x128xf32>
    %c0_3 = arith.constant 0 : index
    %c0_4 = arith.constant 0 : index
    %3 = vector.load %arg3[%c0_3, %c0_4] : memref<1x128xf32, #tpu.memory_space<vmem>>, vector<1x128xf32>
    %4 = vector.broadcast %3 : vector<1x128xf32> to vector<16x128xf32>
    %5 = arith.addf %2, %4 : vector<16x128xf32>
    %c0_5 = arith.constant 0 : index
    %c0_6 = arith.constant 0 : index
    %6 = vector.load %arg4[%c0_5, %c0_6] : memref<16x128xf32, #tpu.memory_space<vmem>>, vector<16x128xf32>
    tpu.vector_store %arg4[%c0_5, %c0_6], %5 {strides = array<i32>} : memref<16x128xf32, #tpu.memory_space<vmem>>, vector<16x128xf32>,
    return
  }
  func.func @transform_0(%arg0: i32) -> (i32, i32) {
    %c0_i32 = arith.constant 0 : i32
    %c0_i32_0 = arith.constant 0 : i32
    return %arg0, %c0_i32 : i32, i32
  }
  func.func @transform_1(%arg0: i32) -> (i32, i32) {
    %c0_i32 = arith.constant 0 : i32
    %c0_i32_0 = arith.constant 0 : i32
    %c0_i32_1 = arith.constant 0 : i32
    return %c0_i32, %c0_i32_0 : i32, i32
  }
  func.func @transform_2(%arg0: i32) -> (i32, i32) {
    %c0_i32 = arith.constant 0 : i32
    %c0_i32_0 = arith.constant 0 : i32
    %c0_i32_1 = arith.constant 0 : i32
    return %c0_i32, %c0_i32_0 : i32, i32
  }
  func.func @transform_3(%arg0: i32) -> (i32, i32) {
    %c0_i32 = arith.constant 0 : i32
    %c0_i32_0 = arith.constant 0 : i32
    return %arg0, %c0_i32 : i32, i32
  }
}

</mosaic_0001>

<bundles_post_ra>
// kernel: patch_embedding.2
= control target key start
LH: loop header
LB: loop body
LE: loop exit
PB: predicated region body
PF: predicated region fallthrough
CT: control target
= control target key end

     0   :  { %s628_s0 = inlined_call_operand.vmem [shape: f32[128,128], index: 0, kind: input, shape index: {}]   ;;  %s629_s1 = inlined_call_operand.vmem [shape: f32[1,128], index: 1, kind: input, shape index: {}]   ;;  %s630_s2 = inlined_call_operand.vmem [shape: f32[32,64], index: 2, kind: input, shape index: {}]   ;;  %s631_s3 = inlined_call_operand.<no memory space> [shape: f32[], index: 3, kind: input, shape index: {}]   ;;  %s632_s4 = inlined_call_operand.hbm [shape: f32[32,128], index: 4, kind: output, shape index: {}]  }
   0x1   :  { %v9_v0 = vstv %s631_s3 }
   0x2   :  { %10 = vsyncpa [#allocation8], 0 }
   0x3   :  { %12 = vsyncpa [#allocation8 + $0x1], 0  ;;  %s485_s17 = smov 0   ;;  %s487_s18 = smov 0  }
   0x4   :  { %s489_s19 = smov 0   ;;  %s491_s20 = smov 0  }
   0x5 LB: > { %s506_s21 = sadd.s32 4294967295, %s453_s20   ;;  %s319_s22 = sadd.s32 4294967294, %s453_s20   ;;  %s453_s20 = sphi %s491_s20, %s638_s20   ;;  %s449_s19 = sphi %s489_s19, %s637_s19   ;;  %s445_s18 = sphi %s487_s18, %s636_s18   ;;  %s441_s17 = sphi %s485_s17, %s635_s17  }
   0x6   : > { %s510_s23 = sadd.s32 1, %s453_s20   ;;  %s93_s24 = sadd.s32 1, %s449_s19 }
   0x7   : > { %s90_s25 = ssub.s32 %s453_s20, %s510_s23  ;;  %p103_p0 = scmp.ne.s32.totalorder %s449_s19, %s445_s18 }
   0x8   : > { %p91_p1 = scmp.eq.s32.totalorder %s90_s25, 0  ;;  %p104_p2 = scmp.eq.s32.totalorder %s506_s21, 1 }
   0x9   : > { %p109_p3 = scmp.ne.s32.totalorder %s445_s18, %s441_s17  ;;  %p110_p4 = scmp.eq.s32.totalorder %s319_s22, 1 }
   0xa   : > { %s521_s26 = scalar_select %p91_p1, %s449_s19, %s93_s24  }
   0xb   : > { %p523_p5 = por %p104_p2, %p103_p0  ;;  %p527_p6 = por %p110_p4, %p109_p3 }
   0xc   : > { %p322_p7 = scmp.ge.s32.totalorder %s453_s20, 1  ;;  %p143_p8 = scmp.lt.s32.totalorder %s453_s20, 3 }
   0xe   : > { %p144_p9 = pnand %p322_p7, %p143_p8 }
   0xf   : > { %s324_s15 = sshll.u32 (!%p144_p9), %s506_s21, 1  ;;  %s164_s10 = sand.u32 (!%p144_p9), 1, %s445_s18  }
  0x10   : > { %147 = sbr.rel (%p144_p9) target bundleno = 186 (0xba), region = 32  ;;  %p168_p10 = scmp.lt.s32.totalorder (!%p144_p9), %s324_s15, 3 }
  0x11   : > { %s332_s12 = sshll.u32 (!%p144_p9), %s506_s21, 4  ;;  %s242_s21 = scalar_lea.sflag (!%p144_p9), [#allocation8], %s164_s10 }
  0x12   : > { %s253_s16 = scalar_lea.hbm (!%p144_p9), %s632_s4, %s332_s12  ;;  %s411_s8 = scalar_lea.hbm (!%p144_p9), %s632_s4, 32 }
  0x13   : > { %s256_s29 = sshll.u32 (!%p144_p9), %s253_s16, 4  ;;  %s257_s29 = int_to_ptr.hbm [resolvable:$true] %s256_s29 }
  0x14   : > { %s405_s30 = sshra.s32 (!%p144_p9), %s257_s29, 4  ;;  %s406_s30 = int_to_ptr.hbm [resolvable:$true] %s405_s30 }
  0x15   : > { %v211_v1 = vld [vmem:[%s628_s0 + $0x78] sm:$0xff]  ;;  %v210_v2 = vld [vmem:[%s628_s0 + $0x70] sm:$0xff]  ;;  %v209_v3 = vld [vmem:[%s628_s0 + $0x68] sm:$0xff]  ;;  %s640_s15 = smov (!%p168_p10, %s324_s15), 3  ;;  %v175_v12 = vlaneseq  ;;  %s407_s5 = scalar_lea.hbm %s406_s30, 16 }
  0x16   : > { %216 = vmatpush.msra.mxu0 %v211_v1  ;;  %333 = vmatpush.msra.mxu1 %v211_v1  ;;  %v208_v4 = vld [vmem:[%s628_s0 + $0x60] sm:$0xff]  ;;  %v207_v5 = vld [vmem:[%s628_s0 + $0x58] sm:$0xff]  ;;  %v206_v6 = vld [vmem:[%s628_s0 + $0x50] sm:$0xff]  ;;  %s325_s11 = sshll.u32 %s640_s15, 3  ;;  %p408_p11 = scmp.ne.s32.totalorder %s406_s30, %s407_s5 }
  0x17   : > { %v205_v7 = vld [vmem:[%s628_s0 + $0x48] sm:$0xff]  ;;  %v204_v8 = vld [vmem:[%s628_s0 + $0x40] sm:$0xff]  ;;  %v203_v9 = vld [vmem:[%s628_s0 + $0x38] sm:$0xff]  ;;  %v176_v15 = vand.u32 127, %v175_v12  ;;  %s171_s22 = scalar_lea.vmem %s630_s2, %s325_s11  ;;  %s323_s11 = sshll.u32 %s164_s10, 4 }
  0x18   : > { %217 = vmatpush.msra.mxu0 %v210_v2  ;;  %334 = vmatpush.msra.mxu1 %v210_v2  ;;  %v202_v10 = vld [vmem:[%s628_s0 + $0x30] sm:$0xff]  ;;  %v201_v11 = vld [vmem:[%s628_s0 + $0x28] sm:$0xff]  ;;  %v200_v13 = vld [vmem:[%s628_s0 + $0x20] sm:$0xff]  ;;  %s166_s25 = scalar_lea.vmem [#allocation7], %s323_s11  ;;  %p409_p12 = pnand %p408_p11, %p523_p5 }
  0x19   : > { %v199_v14 = vld [vmem:[%s628_s0 + $0x18] sm:$0xff]  ;;  %v198_v16 = vld [vmem:[%s628_s0 + $0x10] sm:$0xff]  ;;  %v197_v17 = vld [vmem:[%s628_s0 + $0x8] sm:$0xff]  ;;  %vm178_vm0 = vcmp.lt.s32.totalorder %v176_v15, 64  ;;  %s254_s15 = sshll.u32 %s166_s25, 4  ;;  %p412_p0 = scmp.lt.s32.totalorder %s406_s30, %s632_s4  ;;  %s255_s15 = int_to_ptr.vmem [resolvable:$true] %s254_s15 }
  0x1a   : > { %218 = vmatpush.msra.mxu0 %v209_v3  ;;  %335 = vmatpush.msra.mxu1 %v209_v3  ;;  %v174_v18 = vld [vmem:[%s171_s22] sm:$0xff]  ;;  %v326_v19 = vld [vmem:[%s171_s22 + $0x8] sm:$0xff]  ;;  %p410_p13 = pneg %p409_p12  ;;  %p413_p1 = scmp.lt.s32.totalorder %s411_s8, %s407_s5 }
  0x1b   : > { %v196_v20 = vld [vmem:[%s628_s0] sm:$0xff]  ;;  %v179_v21 = vsel %vm178_vm0, %v174_v18, %v9_v0  ;;  %v189_v22 = vsel %vm178_vm0, %v326_v19, %v9_v0 }
  0x1c   : > { %219 = vmatpush.msra.mxu0 %v208_v4  ;;  %336 = vmatpush.msra.mxu1 %v208_v4  ;;  %v390_v23 = vld [vmem:[%s629_s1] ss:$0 sm:$0xff]  ;;  %p414_p2 = por %p413_p1, %p412_p0 }
  0x1e   : > { %220 = vmatpush.msra.mxu0 %v207_v5  ;;  %337 = vmatpush.msra.mxu1 %v207_v5  ;;  %p415_p3 = pnand %p414_p2, %p410_p13 }
  0x20   : > { %221 = vmatpush.msra.mxu0 %v206_v6  ;;  %338 = vmatpush.msra.mxu1 %v206_v6 }
  0x22   : > { %222 = vmatpush.msra.mxu0 %v205_v7  ;;  %339 = vmatpush.msra.mxu1 %v205_v7 }
  0x24   : > { %223 = vmatpush.msra.mxu0 %v204_v8  ;;  %340 = vmatpush.msra.mxu1 %v204_v8 }
  0x26   : > { %224 = vmatpush.msra.mxu0 %v203_v9  ;;  %341 = vmatpush.msra.mxu1 %v203_v9 }
  0x28   : > { %225 = vmatpush.msra.mxu0 %v202_v10  ;;  %342 = vmatpush.msra.mxu1 %v202_v10 }
  0x2a   : > { %226 = vmatpush.msra.mxu0 %v201_v11  ;;  %343 = vmatpush.msra.mxu1 %v201_v11 }
  0x2c   : > { %227 = vmatpush.msra.mxu0 %v200_v13  ;;  %344 = vmatpush.msra.mxu1 %v200_v13 }
  0x2e   : > { %228 = vmatpush.msra.mxu0 %v199_v14  ;;  %345 = vmatpush.msra.mxu1 %v199_v14 }
  0x30   : > { %229 = vmatpush.msra.mxu0 %v198_v16  ;;  %346 = vmatpush.msra.mxu1 %v198_v16 }
  0x32   : > { %230 = vmatpush.msra.mxu0 %v197_v17  ;;  %347 = vmatpush.msra.mxu1 %v197_v17 }
  0x34   : > { %231 = vmatpush.msra.mxu0 %v196_v20  ;;  %348 = vmatpush.msra.mxu1 %v196_v20 }
  0x35   : > { %232 = vmatmul.f32.vlgmr.msra.gmra.mxu0 %v179_v21  ;;  %235 = vmatmul.f32.vlgmr.msra.gmra.mxu1 %v189_v22 }
  0xb2   : > { %v233_v24 = vpop.f32.mrf.mxu0  ;;  %v236_v25 = vpop.f32.mrf.mxu1 }
  0xb3   : > { %v234_v26 = vadd.f32 %v390_v23, %v233_v24  ;;  %v237_v27 = vadd.f32 %v390_v23, %v236_v25 }
  0xb5   : > { %239 = vst [vmem:[%s166_s25] sm:$0xff] %v234_v26 }
  0xb6   : > { %240 = vst [vmem:[%s166_s25 + $0x8] sm:$0xff] %v237_v27 }
  0xb7   : > { %418 = shalt.err (!%p415_p3)
}
  0xb8   : > { %s455_s10 = smov 128   ;;  %s456_s12 = smov 8  }
  0xb9   : > { %349 = dma.vmem_to_hbm [thread:$0]  (%p523_p5), %s255_s15, 256, %s257_s29, %s242_s21, %s455_s10, %s455_s10, %s456_s12  }
  0xba PF: > { %p355_p4 = scmp.ge.s32.totalorder %s453_s20, 2  ;;  %s271_s13 = sand.u32 1, %s441_s17  }
  0xbb   : > { %s272_s14 = scalar_lea.sflag [#allocation8], %s271_s13 }
  0xbc   : > { %p352_p7 = pnand %p355_p4, %p527_p6 }
  0xbe   : > { %p353_p8 = pneg %p352_p7 }
  0xc0   : > { %436 = dma.done.wait (%p353_p8), %s272_s14, 256  }
  0xc1   : > { %438 = vsyncadd (%p353_p8), %s272_s14, 4294967040  ;;  %p15_p9 = scmp.ge.s32.totalorder %s510_s23, 4   ;;  %s635_s17 = smov %s445_s18 }
  0xc2   : > { %s636_s18 = smov %s449_s19  ;;  %s637_s19 = smov %s521_s26 }
  0xc3   : > { %s638_s20 = smov %s510_s23  ;;  %17 = sbr.rel (!%p15_p9) target bundleno = 5 (0x5), region = 69 }
  0xc8   :  { %278 = vsyncpa [#allocation8], 1 }
  0xc9   :  { %280 = vsyncpa [#allocation8 + $0x1], 1 }

</bundles_post_ra>
